<compile_context>
chip_gen: v7x
topology: tpu7x:2x2x1
jax: 0.10.0
libtpu: 0.0.40
codegen_flags: <defaults>
</compile_context>

<pallas_src>
import jax
import jax.numpy as jnp
from jax.experimental import pallas as pl
from jax.experimental.pallas import tpu as pltpu


def _round_up(x, m):
    return (x + m - 1) // m * m


def _make_kernel(H, W, TR, Wp):
    TRH = TR + 2  # row tile + 1-row halo on each side

    def kernel(kp_ref, d_hbm, out_ref, dbuf, sem):
        b = pl.program_id(0)
        r = pl.program_id(1)
        nr = pl.num_programs(1)
        slot = r % 2

        # Scalar reads BEFORE any DMA wait (keep SMEM sst->sld forwarding).
        ifx = kp_ref[b, 0]   # 1 / fx
        ify = kp_ref[b, 1]   # 1 / fy
        cx = kp_ref[b, 2]
        cy = kp_ref[b, 3]

        def tile_copy(rr, sl):
            start = pl.multiple_of(rr * TR, 8)   # TR % 8 == 0 by construction
            return pltpu.make_async_copy(
                d_hbm.at[b, pl.ds(start, TRH), :],
                dbuf.at[sl],
                sem.at[sl],
            )

        # Prime at the first row tile of each batch element.  The prefetch chain
        # never crosses the batch axis -> "parallel" batch dimension is safe.
        @pl.when(r == 0)
        def _():
            tile_copy(r, slot).start()

        tile_copy(r, slot).wait()

        # Prefetch the next row tile of this batch element into the other slot.
        @pl.when(r + 1 < nr)
        def _():
            tile_copy(r + 1, 1 - slot).start()

        # ---------------- compute on the (TRH, Wp) tile ----------------
        d = dbuf[slot].astype(jnp.float32)

        col = jax.lax.broadcasted_iota(jnp.int32, (TRH, Wp), 1)
        rowg = jax.lax.broadcasted_iota(jnp.int32, (TRH, Wp), 0) + (r * TR - 1)
        gx = col.astype(jnp.float32)
        gy = rowg.astype(jnp.float32)

        # Pinhole unprojection with hoisted scalar reciprocals (no vector divide).
        px = (gx - cx) * d * ifx
        py = (gy - cy) * d * ify
        pz = d

        def east(a):   # a[i, j+1] at (i, j)
            return pltpu.roll(a, Wp - 1, 1)

        def west(a):   # a[i, j-1]
            return pltpu.roll(a, 1, 1)

        def south(a):  # a[i+1, j]
            return pltpu.roll(a, TRH - 1, 0)

        def north(a):  # a[i-1, j]
            return pltpu.roll(a, 1, 0)

        # vw = p - p_east ; vs = p_south - p
        vwx, vwy, vwz = px - east(px), py - east(py), pz - east(pz)
        vsx, vsy, vsz = south(px) - px, south(py) - py, south(pz) - pz

        # ve = -west(vw), vn = -north(vs)  =>  cross(ve, vn) = cross(west(vw), north(vs))
        wvx, wvy, wvz = west(vwx), west(vwy), west(vwz)
        nsx, nsy, nsz = north(vsx), north(vsy), north(vsz)

        nx = (vwy * vsz - vwz * vsy) + (wvy * nsz - wvz * nsy)
        ny = (vwz * vsx - vwx * vsz) + (wvz * nsx - wvx * nsz)
        nz = (vwx * vsy - vwy * vsx) + (wvx * nsy - wvy * nsx)

        # L2-normalize via EUP rsqrt (equivalent to / max(||n||, 1e-12)).
        sumsq = nx * nx + ny * ny + nz * nz
        inv = jax.lax.rsqrt(jnp.maximum(sumsq, 1e-24))
        nx = nx * inv
        ny = ny * inv
        nz = nz * inv

        # Camera-facing flip fused with 1-pixel border zeroing:
        #   sum(eye * n) < 0  <=>  p . n > 0
        flip = (px * nx + py * ny + pz * nz) > 0.0
        interior = ((rowg >= 1) & (rowg <= H - 2)
                    & (col >= 1) & (col <= W - 2))
        s = jnp.where(interior, jnp.where(flip, -1.0, 1.0), 0.0)
        nx = nx * s
        ny = ny * s
        nz = nz * s

        out_ref[0, 0, :, :] = nx[1:TR + 1, :]
        out_ref[0, 1, :, :] = ny[1:TR + 1, :]
        out_ref[0, 2, :, :] = nz[1:TR + 1, :]

    return kernel


@jax.jit
def depth2normal(depth, K):
    """depth: (B, 1, H, W), K: (B, 3, 3) -> normals (B, 3, H, W) f32."""
    B, C, H, W = depth.shape
    assert C == 1

    # Lane-dense last dim; row tile sized so live intermediates fit scoped VMEM.
    Wp = _round_up(max(W, 128), 128)
    row_bytes = Wp * 4
    tr_cap = max(8, min(512, (512 * 1024 // row_bytes) // 8 * 8))
    TR = min(tr_cap, _round_up(H, 8))
    Hp = _round_up(H, TR)
    NR = Hp // TR

    # 1-row halo top+bottom + lane/row padding; keep the original dtype
    # (cast to f32 happens inside the kernel).
    dpad = jnp.pad(depth.reshape(B, H, W),
                   ((0, 0), (1, Hp - H + 1), (0, Wp - W)))

    Kf = K.astype(jnp.float32)
    kparams = jnp.stack(
        [1.0 / Kf[:, 0, 0], 1.0 / Kf[:, 1, 1], Kf[:, 0, 2], Kf[:, 1, 2]],
        axis=1)

    kernel = _make_kernel(H, W, TR, Wp)
    out = pl.pallas_call(
        kernel,
        out_shape=jax.ShapeDtypeStruct((B, 3, Hp, Wp), jnp.float32),
        grid=(B, NR),
        in_specs=[
            pl.BlockSpec(memory_space=pltpu.MemorySpace.SMEM),  # [1/fx,1/fy,cx,cy]
            pl.BlockSpec(memory_space=pl.ANY),                  # padded depth, HBM
        ],
        out_specs=pl.BlockSpec((1, 3, TR, Wp), lambda b, r: (b, 0, r, 0)),
        scratch_shapes=[
            pltpu.VMEM((2, TR + 2, Wp), depth.dtype),            # double-buffered tile
            pltpu.SemaphoreType.DMA((2,)),
        ],
        compiler_params=pltpu.CompilerParams(
            dimension_semantics=("parallel", "arbitrary")),
    )(kparams, dpad)
    return out[:, :, :H, :W]


def _reference(depth, K):
    """Pure-JAX transcription of the PyTorch module (slice-based)."""
    B, _, H, W = depth.shape
    gy = jnp.broadcast_to(jnp.arange(H, dtype=jnp.float32)[:, None], (H, W))
    gx = jnp.broadcast_to(jnp.arange(W, dtype=jnp.float32)[None, :], (H, W))
    fx = K[:, 0, 0][:, None, None, None]
    fy = K[:, 1, 1][:, None, None, None]
    cx = K[:, 0, 2][:, None, None, None]
    cy = K[:, 1, 2][:, None, None, None]
    z = depth.astype(jnp.float32)
    x = (gx[None, None] - cx) * z / fx
    y = (gy[None, None] - cy) * z / fy
    p = jnp.concatenate([x, y, z], axis=1)          # (B, 3, H, W)

    eye = -p
    p_cur = p[:, :, 1:-1, 1:-1]
    vw = p_cur - p[:, :, 1:-1, 2:]
    vs = p[:, :, 2:, 1:-1] - p_cur
    ve = p_cur - p[:, :, 1:-1, :-2]
    vn = p[:, :, :-2, 1:-1] - p_cur
    n1 = jnp.cross(vw, vs, axis=1)
    n2 = jnp.cross(ve, vn, axis=1)
    n = n1 + n2
    norm = jnp.sqrt(jnp.sum(n * n, axis=1, keepdims=True))
    n = n / jnp.maximum(norm, 1e-12)
    n = jnp.pad(n, ((0, 0), (0, 0), (1, 1), (1, 1)))
    dot = jnp.sum(eye * n, axis=1, keepdims=True)
    n = jnp.where(dot < 0, -n, n)
    return n


if __name__ == "__main__":
    B, H, W = 2, 16, 16
    key = jax.random.PRNGKey(0)
    noise = jax.random.uniform(key, (B, 1, H, W), jnp.float32, -0.02, 0.02)
    yy = (jnp.arange(H, dtype=jnp.float32) / H)[:, None]
    xx = (jnp.arange(W, dtype=jnp.float32) / W)[None, :]
    depth = 1.2 + 0.3 * xx + 0.2 * yy + noise       # smooth-ish surface, (B,1,H,W)

    fx, fy = 12.0, 11.0
    cx, cy = (W - 1) / 2.0, (H - 1) / 2.0
    K = jnp.broadcast_to(
        jnp.array([[fx, 0.0, cx], [0.0, fy, cy], [0.0, 0.0, 1.0]], jnp.float32),
        (B, 3, 3),
    )

    out = jax.block_until_ready(depth2normal(depth, K))
    ref = _reference(depth, K)
    assert out.shape == (B, 3, H, W)
    err = float(jnp.max(jnp.abs(out - ref)))
    assert err < 5e-5, err
    print("KERNEL_OK")
</pallas_src>

<mosaic_0001>
module attributes {stable_mosaic.version = 11 : i64} {
  func.func @kernel(%arg0: i32, %arg1: i32, %arg2: memref<2x4xf32, #tpu.memory_space<smem>>, %arg3: memref<2x18x128xf32, #tpu.memory_space<any>>, %arg4: memref<1x3x16x128xf32, #tpu.memory_space<vmem>>, %arg5: memref<2x18x128xf32, #tpu.memory_space<vmem>>, %arg6: memref<2x!tpu.dma_semaphore, #tpu.memory_space<semaphore_mem>>) attributes {dimension_semantics = [#tpu.dimension_semantics<parallel>, #tpu.dimension_semantics<arbitrary>], iteration_bounds = array<i64: 2, 1>, scalar_prefetch = 0 : i64, scratch_operands = 2 : i64, tpu.core_type = #tpu.core_type<tc>, window_params = [{transform_indices = @transform_0, window_bounds = array<i64: 2, 4>}, {}, {transform_indices = @transform_2, window_bounds = array<i64: 1, 3, 16, 128>}]} {
    %c2_i32 = arith.constant 2 : i32
    %c0_i32 = arith.constant 0 : i32
    %0 = arith.cmpi eq, %c2_i32, %c0_i32 : i32
    %c1_i32 = arith.constant 1 : i32
    %1 = arith.select %0, %c1_i32, %c2_i32 : i32
    %2 = arith.remsi %arg1, %1 : i32
    %c0_i32_0 = arith.constant 0 : i32
    %3 = arith.cmpi ne, %2, %c0_i32_0 : i32
    %c0_i32_1 = arith.constant 0 : i32
    %4 = arith.cmpi slt, %2, %c0_i32_1 : i32
    %c0_i32_2 = arith.constant 0 : i32
    %5 = arith.cmpi slt, %1, %c0_i32_2 : i32
    %6 = arith.xori %4, %5 : i1
    %7 = arith.andi %6, %3 : i1
    %8 = arith.addi %2, %1 : i32
    %9 = arith.select %7, %8, %2 : i32
    %10 = arith.index_cast %arg0 : i32 to index
    %c0 = arith.constant 0 : index
    %11 = memref.load %arg2[%10, %c0] : memref<2x4xf32, #tpu.memory_space<smem>>
    %12 = arith.index_cast %arg0 : i32 to index
    %c1 = arith.constant 1 : index
    %13 = memref.load %arg2[%12, %c1] : memref<2x4xf32, #tpu.memory_space<smem>>
    %14 = arith.index_cast %arg0 : i32 to index
    %c2 = arith.constant 2 : index
    %15 = memref.load %arg2[%14, %c2] : memref<2x4xf32, #tpu.memory_space<smem>>
    %16 = arith.index_cast %arg0 : i32 to index
    %c3 = arith.constant 3 : index
    %17 = memref.load %arg2[%16, %c3] : memref<2x4xf32, #tpu.memory_space<smem>>
    %c0_i32_3 = arith.constant 0 : i32
    %18 = arith.cmpi eq, %arg1, %c0_i32_3 : i32
    %19 = arith.extui %18 : i1 to i32
    %c0_i32_4 = arith.constant 0 : i32
    %20 = arith.cmpi ne, %19, %c0_i32_4 : i32
    scf.if %20 {
      %c16_i32_44 = arith.constant 16 : i32
      %142 = arith.muli %arg1, %c16_i32_44 : i32
      %143 = tpu.assume_multiple %142, 8 : i32
      %c0_i32_45 = arith.constant 0 : i32
      %144 = tpu.memref_slice %arg3[%arg0, %143, %c0_i32_45] : memref<2x18x128xf32, #tpu.memory_space<any>> -> memref<1x18x128xf32, #tpu.memory_space<any>>
      %145 = tpu.memref_squeeze %144 : memref<1x18x128xf32, #tpu.memory_space<any>> -> memref<18x128xf32, #tpu.memory_space<any>>
      %c0_i32_46 = arith.constant 0 : i32
      %c0_i32_47 = arith.constant 0 : i32
      %146 = tpu.memref_slice %arg5[%9, %c0_i32_46, %c0_i32_47] : memref<2x18x128xf32, #tpu.memory_space<vmem>> -> memref<1x18x128xf32, #tpu.memory_space<vmem>>
      %147 = tpu.memref_squeeze %146 : memref<1x18x128xf32, #tpu.memory_space<vmem>> -> memref<18x128xf32, #tpu.memory_space<vmem>>
      %148 = tpu.memref_slice %arg6[%9] : memref<2x!tpu.dma_semaphore, #tpu.memory_space<semaphore_mem>> -> memref<1x!tpu.dma_semaphore, #tpu.memory_space<semaphore_mem>>
      %149 = tpu.memref_squeeze %148 : memref<1x!tpu.dma_semaphore, #tpu.memory_space<semaphore_mem>> -> memref<!tpu.dma_semaphore, #tpu.memory_space<semaphore_mem>>
      tpu.enqueue_dma source(%145 : memref<18x128xf32, #tpu.memory_space<any>>) target(%147 : memref<18x128xf32, #tpu.memory_space<vmem>>) target_semaphore(%149 : memref<!tpu.dma_semaphore, #tpu.memory_space<semaphore_mem>>)
    } else {
    }
    %c16_i32 = arith.constant 16 : i32
    %21 = arith.muli %arg1, %c16_i32 : i32
    %22 = tpu.assume_multiple %21, 8 : i32
    %c0_i32_5 = arith.constant 0 : i32
    %23 = tpu.memref_slice %arg3[%arg0, %22, %c0_i32_5] : memref<2x18x128xf32, #tpu.memory_space<any>> -> memref<1x18x128xf32, #tpu.memory_space<any>>
    %24 = tpu.memref_squeeze %23 : memref<1x18x128xf32, #tpu.memory_space<any>> -> memref<18x128xf32, #tpu.memory_space<any>>
    %c0_i32_6 = arith.constant 0 : i32
    %c0_i32_7 = arith.constant 0 : i32
    %25 = tpu.memref_slice %arg5[%9, %c0_i32_6, %c0_i32_7] : memref<2x18x128xf32, #tpu.memory_space<vmem>> -> memref<1x18x128xf32, #tpu.memory_space<vmem>>
    %26 = tpu.memref_squeeze %25 : memref<1x18x128xf32, #tpu.memory_space<vmem>> -> memref<18x128xf32, #tpu.memory_space<vmem>>
    %27 = tpu.memref_slice %arg6[%9] : memref<2x!tpu.dma_semaphore, #tpu.memory_space<semaphore_mem>> -> memref<1x!tpu.dma_semaphore, #tpu.memory_space<semaphore_mem>>
    %28 = tpu.memref_squeeze %27 : memref<1x!tpu.dma_semaphore, #tpu.memory_space<semaphore_mem>> -> memref<!tpu.dma_semaphore, #tpu.memory_space<semaphore_mem>>
    tpu.wait_dma2 semaphore(%28 : memref<!tpu.dma_semaphore, #tpu.memory_space<semaphore_mem>>) src(%24 : memref<18x128xf32, #tpu.memory_space<any>>) dst(%26 : memref<18x128xf32, #tpu.memory_space<vmem>>)
    %c1_i32_8 = arith.constant 1 : i32
    %29 = arith.addi %arg1, %c1_i32_8 : i32
    %c1_i32_9 = arith.constant 1 : i32
    %30 = arith.cmpi slt, %29, %c1_i32_9 : i32
    %31 = arith.extui %30 : i1 to i32
    %c0_i32_10 = arith.constant 0 : i32
    %32 = arith.cmpi ne, %31, %c0_i32_10 : i32
    scf.if %32 {
      %c1_i32_44 = arith.constant 1 : i32
      %142 = arith.addi %arg1, %c1_i32_44 : i32
      %c1_i32_45 = arith.constant 1 : i32
      %143 = arith.subi %c1_i32_45, %9 : i32
      %c16_i32_46 = arith.constant 16 : i32
      %144 = arith.muli %142, %c16_i32_46 : i32
      %145 = tpu.assume_multiple %144, 8 : i32
      %c0_i32_47 = arith.constant 0 : i32
      %146 = tpu.memref_slice %arg3[%arg0, %145, %c0_i32_47] : memref<2x18x128xf32, #tpu.memory_space<any>> -> memref<1x18x128xf32, #tpu.memory_space<any>>
      %147 = tpu.memref_squeeze %146 : memref<1x18x128xf32, #tpu.memory_space<any>> -> memref<18x128xf32, #tpu.memory_space<any>>
      %c0_i32_48 = arith.constant 0 : i32
      %c0_i32_49 = arith.constant 0 : i32
      %148 = tpu.memref_slice %arg5[%143, %c0_i32_48, %c0_i32_49] : memref<2x18x128xf32, #tpu.memory_space<vmem>> -> memref<1x18x128xf32, #tpu.memory_space<vmem>>
      %149 = tpu.memref_squeeze %148 : memref<1x18x128xf32, #tpu.memory_space<vmem>> -> memref<18x128xf32, #tpu.memory_space<vmem>>
      %150 = tpu.memref_slice %arg6[%143] : memref<2x!tpu.dma_semaphore, #tpu.memory_space<semaphore_mem>> -> memref<1x!tpu.dma_semaphore, #tpu.memory_space<semaphore_mem>>
      %151 = tpu.memref_squeeze %150 : memref<1x!tpu.dma_semaphore, #tpu.memory_space<semaphore_mem>> -> memref<!tpu.dma_semaphore, #tpu.memory_space<semaphore_mem>>
      tpu.enqueue_dma source(%147 : memref<18x128xf32, #tpu.memory_space<any>>) target(%149 : memref<18x128xf32, #tpu.memory_space<vmem>>) target_semaphore(%151 : memref<!tpu.dma_semaphore, #tpu.memory_space<semaphore_mem>>)
    } else {
    }
    %33 = arith.index_cast %9 : i32 to index
    %c0_11 = arith.constant 0 : index
    %c0_12 = arith.constant 0 : index
    %34 = vector.load %arg5[%33, %c0_11, %c0_12] : memref<2x18x128xf32, #tpu.memory_space<vmem>>, vector<1x18x128xf32>
    %35 = vector.shape_cast %34 : vector<1x18x128xf32> to vector<18x128xf32>
    %36 = tpu.iota {dimensions = array<i32: 1>} : vector<18x128xi32>
    %37 = tpu.iota {dimensions = array<i32: 0>} : vector<18x128xi32>
    %c16_i32_13 = arith.constant 16 : i32
    %38 = arith.muli %arg1, %c16_i32_13 : i32
    %c1_i32_14 = arith.constant 1 : i32
    %39 = arith.subi %38, %c1_i32_14 : i32
    %40 = vector.broadcast %39 : i32 to vector<18x128xi32>
    %41 = arith.addi %37, %40 : vector<18x128xi32>
    %42 = arith.sitofp %36 : vector<18x128xi32> to vector<18x128xf32>
    %43 = arith.sitofp %41 : vector<18x128xi32> to vector<18x128xf32>
    %44 = vector.broadcast %15 : f32 to vector<18x128xf32>
    %45 = arith.subf %42, %44 : vector<18x128xf32>
    %46 = arith.mulf %45, %35 : vector<18x128xf32>
    %47 = vector.broadcast %11 : f32 to vector<18x128xf32>
    %48 = arith.mulf %46, %47 : vector<18x128xf32>
    %49 = vector.broadcast %17 : f32 to vector<18x128xf32>
    %50 = arith.subf %43, %49 : vector<18x128xf32>
    %51 = arith.mulf %50, %35 : vector<18x128xf32>
    %52 = vector.broadcast %13 : f32 to vector<18x128xf32>
    %53 = arith.mulf %51, %52 : vector<18x128xf32>
    %c127_i32 = arith.constant 127 : i32
    %54 = tpu.dynamic_rotate %48 by %c127_i32 dim 1 : vector<18x128xf32>, i32 -> vector<18x128xf32>
    %55 = arith.subf %48, %54 : vector<18x128xf32>
    %c127_i32_15 = arith.constant 127 : i32
    %56 = tpu.dynamic_rotate %53 by %c127_i32_15 dim 1 : vector<18x128xf32>, i32 -> vector<18x128xf32>
    %57 = arith.subf %53, %56 : vector<18x128xf32>
    %c127_i32_16 = arith.constant 127 : i32
    %58 = tpu.dynamic_rotate %35 by %c127_i32_16 dim 1 : vector<18x128xf32>, i32 -> vector<18x128xf32>
    %59 = arith.subf %35, %58 : vector<18x128xf32>
    %c17_i32 = arith.constant 17 : i32
    %60 = tpu.dynamic_rotate %48 by %c17_i32 dim 0 : vector<18x128xf32>, i32 -> vector<18x128xf32>
    %61 = arith.subf %60, %48 : vector<18x128xf32>
    %c17_i32_17 = arith.constant 17 : i32
    %62 = tpu.dynamic_rotate %53 by %c17_i32_17 dim 0 : vector<18x128xf32>, i32 -> vector<18x128xf32>
    %63 = arith.subf %62, %53 : vector<18x128xf32>
    %c17_i32_18 = arith.constant 17 : i32
    %64 = tpu.dynamic_rotate %35 by %c17_i32_18 dim 0 : vector<18x128xf32>, i32 -> vector<18x128xf32>
    %65 = arith.subf %64, %35 : vector<18x128xf32>
    %c1_i32_19 = arith.constant 1 : i32
    %66 = tpu.dynamic_rotate %55 by %c1_i32_19 dim 1 : vector<18x128xf32>, i32 -> vector<18x128xf32>
    %c1_i32_20 = arith.constant 1 : i32
    %67 = tpu.dynamic_rotate %57 by %c1_i32_20 dim 1 : vector<18x128xf32>, i32 -> vector<18x128xf32>
    %c1_i32_21 = arith.constant 1 : i32
    %68 = tpu.dynamic_rotate %59 by %c1_i32_21 dim 1 : vector<18x128xf32>, i32 -> vector<18x128xf32>
    %c1_i32_22 = arith.constant 1 : i32
    %69 = tpu.dynamic_rotate %61 by %c1_i32_22 dim 0 : vector<18x128xf32>, i32 -> vector<18x128xf32>
    %c1_i32_23 = arith.constant 1 : i32
    %70 = tpu.dynamic_rotate %63 by %c1_i32_23 dim 0 : vector<18x128xf32>, i32 -> vector<18x128xf32>
    %c1_i32_24 = arith.constant 1 : i32
    %71 = tpu.dynamic_rotate %65 by %c1_i32_24 dim 0 : vector<18x128xf32>, i32 -> vector<18x128xf32>
    %72 = arith.mulf %57, %65 : vector<18x128xf32>
    %73 = arith.mulf %59, %63 : vector<18x128xf32>
    %74 = arith.subf %72, %73 : vector<18x128xf32>
    %75 = arith.mulf %67, %71 : vector<18x128xf32>
    %76 = arith.mulf %68, %70 : vector<18x128xf32>
    %77 = arith.subf %75, %76 : vector<18x128xf32>
    %78 = arith.addf %74, %77 : vector<18x128xf32>
    %79 = arith.mulf %59, %61 : vector<18x128xf32>
    %80 = arith.mulf %55, %65 : vector<18x128xf32>
    %81 = arith.subf %79, %80 : vector<18x128xf32>
    %82 = arith.mulf %68, %69 : vector<18x128xf32>
    %83 = arith.mulf %66, %71 : vector<18x128xf32>
    %84 = arith.subf %82, %83 : vector<18x128xf32>
    %85 = arith.addf %81, %84 : vector<18x128xf32>
    %86 = arith.mulf %55, %63 : vector<18x128xf32>
    %87 = arith.mulf %57, %61 : vector<18x128xf32>
    %88 = arith.subf %86, %87 : vector<18x128xf32>
    %89 = arith.mulf %66, %70 : vector<18x128xf32>
    %90 = arith.mulf %67, %69 : vector<18x128xf32>
    %91 = arith.subf %89, %90 : vector<18x128xf32>
    %92 = arith.addf %88, %91 : vector<18x128xf32>
    %93 = arith.mulf %78, %78 : vector<18x128xf32>
    %94 = arith.mulf %85, %85 : vector<18x128xf32>
    %95 = arith.addf %93, %94 : vector<18x128xf32>
    %96 = arith.mulf %92, %92 : vector<18x128xf32>
    %97 = arith.addf %95, %96 : vector<18x128xf32>
    %cst = arith.constant 1.000000e-24 : f32
    %98 = vector.broadcast %cst : f32 to vector<18x128xf32>
    %99 = arith.maximumf %97, %98 : vector<18x128xf32>
    %100 = math.rsqrt %99 : vector<18x128xf32>
    %101 = arith.mulf %78, %100 : vector<18x128xf32>
    %102 = arith.mulf %85, %100 : vector<18x128xf32>
    %103 = arith.mulf %92, %100 : vector<18x128xf32>
    %104 = arith.mulf %48, %101 : vector<18x128xf32>
    %105 = arith.mulf %53, %102 : vector<18x128xf32>
    %106 = arith.addf %104, %105 : vector<18x128xf32>
    %107 = arith.mulf %35, %103 : vector<18x128xf32>
    %108 = arith.addf %106, %107 : vector<18x128xf32>
    %cst_25 = arith.constant 0.000000e+00 : f32
    %109 = vector.broadcast %cst_25 : f32 to vector<18x128xf32>
    %110 = arith.cmpf ogt, %108, %109 : vector<18x128xf32>
    %c1_i32_26 = arith.constant 1 : i32
    %111 = vector.broadcast %c1_i32_26 : i32 to vector<18x128xi32>
    %112 = arith.cmpi sge, %41, %111 : vector<18x128xi32>
    %c14_i32 = arith.constant 14 : i32
    %113 = vector.broadcast %c14_i32 : i32 to vector<18x128xi32>
    %114 = arith.cmpi sle, %41, %113 : vector<18x128xi32>
    %115 = arith.andi %112, %114 : vector<18x128xi1>
    %c1_i32_27 = arith.constant 1 : i32
    %116 = vector.broadcast %c1_i32_27 : i32 to vector<18x128xi32>
    %117 = arith.cmpi sge, %36, %116 : vector<18x128xi32>
    %118 = arith.andi %115, %117 : vector<18x128xi1>
    %c14_i32_28 = arith.constant 14 : i32
    %119 = vector.broadcast %c14_i32_28 : i32 to vector<18x128xi32>
    %120 = arith.cmpi sle, %36, %119 : vector<18x128xi32>
    %121 = arith.andi %118, %120 : vector<18x128xi1>
    %cst_29 = arith.constant -1.000000e+00 : f32
    %cst_30 = arith.constant 1.000000e+00 : f32
    %122 = vector.broadcast %cst_29 : f32 to vector<18x128xf32>
    %123 = vector.broadcast %cst_30 : f32 to vector<18x128xf32>
    %124 = arith.select %110, %122, %123 : vector<18x128xi1>, vector<18x128xf32>
    %cst_31 = arith.constant 0.000000e+00 : f32
    %125 = vector.broadcast %cst_31 : f32 to vector<18x128xf32>
    %126 = arith.select %121, %124, %125 : vector<18x128xi1>, vector<18x128xf32>
    %127 = arith.mulf %101, %126 : vector<18x128xf32>
    %128 = arith.mulf %102, %126 : vector<18x128xf32>
    %129 = arith.mulf %103, %126 : vector<18x128xf32>
    %130 = vector.extract_strided_slice %127 {offsets = [1, 0], sizes = [16, 128], strides = [1, 1]} : vector<18x128xf32> to vector<16x128xf32>
    %c0_32 = arith.constant 0 : index
    %c0_33 = arith.constant 0 : index
    %c0_34 = arith.constant 0 : index
    %c0_35 = arith.constant 0 : index
    %131 = vector.load %arg4[%c0_32, %c0_33, %c0_34, %c0_35] : memref<1x3x16x128xf32, #tpu.memory_space<vmem>>, vector<1x1x16x128xf32>
    %132 = vector.shape_cast %131 : vector<1x1x16x128xf32> to vector<16x128xf32>
    %133 = vector.shape_cast %130 : vector<16x128xf32> to vector<1x1x16x128xf32>
    tpu.vector_store %arg4[%c0_32, %c0_33, %c0_34, %c0_35], %133 {strides = array<i32>} : memref<1x3x16x128xf32, #tpu.memory_space<vmem>>, vector<1x1x16x128xf32>,
    %134 = vector.extract_strided_slice %128 {offsets = [1, 0], sizes = [16, 128], strides = [1, 1]} : vector<18x128xf32> to vector<16x128xf32>
    %c0_36 = arith.constant 0 : index
    %c1_37 = arith.constant 1 : index
    %c0_38 = arith.constant 0 : index
    %c0_39 = arith.constant 0 : index
    %135 = vector.load %arg4[%c0_36, %c1_37, %c0_38, %c0_39] : memref<1x3x16x128xf32, #tpu.memory_space<vmem>>, vector<1x1x16x128xf32>
    %136 = vector.shape_cast %135 : vector<1x1x16x128xf32> to vector<16x128xf32>
    %137 = vector.shape_cast %134 : vector<16x128xf32> to vector<1x1x16x128xf32>
    tpu.vector_store %arg4[%c0_36, %c1_37, %c0_38, %c0_39], %137 {strides = array<i32>} : memref<1x3x16x128xf32, #tpu.memory_space<vmem>>, vector<1x1x16x128xf32>,
    %138 = vector.extract_strided_slice %129 {offsets = [1, 0], sizes = [16, 128], strides = [1, 1]} : vector<18x128xf32> to vector<16x128xf32>
    %c0_40 = arith.constant 0 : index
    %c2_41 = arith.constant 2 : index
    %c0_42 = arith.constant 0 : index
    %c0_43 = arith.constant 0 : index
    %139 = vector.load %arg4[%c0_40, %c2_41, %c0_42, %c0_43] : memref<1x3x16x128xf32, #tpu.memory_space<vmem>>, vector<1x1x16x128xf32>
    %140 = vector.shape_cast %139 : vector<1x1x16x128xf32> to vector<16x128xf32>
    %141 = vector.shape_cast %138 : vector<16x128xf32> to vector<1x1x16x128xf32>
    tpu.vector_store %arg4[%c0_40, %c2_41, %c0_42, %c0_43], %141 {strides = array<i32>} : memref<1x3x16x128xf32, #tpu.memory_space<vmem>>, vector<1x1x16x128xf32>,
    return
  }
  func.func @transform_0(%arg0: i32, %arg1: i32) -> (i32, i32) {
    %c0_i32 = arith.constant 0 : i32
    %c0_i32_0 = arith.constant 0 : i32
    %c0_i32_1 = arith.constant 0 : i32
    return %c0_i32, %c0_i32_0 : i32, i32
  }
  func.func @transform_2(%arg0: i32, %arg1: i32) -> (i32, i32, i32, i32) {
    %c0_i32 = arith.constant 0 : i32
    %c0_i32_0 = arith.constant 0 : i32
    %c0_i32_1 = arith.constant 0 : i32
    return %arg0, %c0_i32, %arg1, %c0_i32_0 : i32, i32, i32, i32
  }
}

</mosaic_0001>

<bundles_post_ra>
// kernel: depth2normal.1
= control target key start
LH: loop header
LB: loop body
LE: loop exit
PB: predicated region body
PF: predicated region fallthrough
CT: control target
= control target key end

     0   :  { %7 = vsyncpa [#allocation6], 0  ;;  %s1442_s0 = inlined_call_operand.vmem [shape: f32[2,4], index: 0, kind: input, shape index: {}]   ;;  %s1443_s1 = inlined_call_operand.vmem [shape: f32[2,18,128], index: 1, kind: input, shape index: {}]   ;;  %s1444_s2 = inlined_call_operand.hbm [shape: f32[2,3,16,128], index: 2, kind: output, shape index: {}]  }
   0x1   :  { %8 = vsyncpa [#allocation5], 0 }
   0x2   :  { %10 = vsyncpa [#allocation5 + $0x1], 0  ;;  %s1041_s9 = smov 0   ;;  %s1043_s10 = smov 0  }
   0x3   :  { %s1045_s11 = smov 0   ;;  %s1047_s12 = smov 0  }
   0x4   :  { %s1049_s13 = smov 0   ;;  %s1051_s14 = smov 0  }
   0x5 LB: > { %s809_s15 = sadd.s32 4294967295, %s1017_s14   ;;  %s810_s16 = sadd.s32 4294967294, %s1017_s14   ;;  %s1017_s14 = sphi %s1051_s14, %s16_s14   ;;  %s1013_s13 = sphi %s1049_s13, %s1453_s13   ;;  %s1009_s12 = sphi %s1047_s12, %s1452_s12   ;;  %s1005_s11 = sphi %s1045_s11, %s1451_s11   ;;  %s1001_s10 = sphi %s1043_s10, %s1450_s10   ;;  %s997_s9 = sphi %s1041_s9, %s1449_s9  }
   0x6   : > { %s28_s17 = sadd.s32 1, %s1013_s13  ;;  %s58_s18 = sadd.s32 1, %s1005_s11 }
   0x7   : > { %p30_p0 = scmp.ge.s32.totalorder %s28_s17, 2  ;;  %p68_p1 = scmp.ne.s32.totalorder %s1005_s11, %s1001_s10 }
   0x8   : > { %p69_p2 = scmp.eq.s32.totalorder %s809_s15, 1  ;;  %p74_p3 = scmp.ne.s32.totalorder %s1001_s10, %s997_s9 }
   0x9   : > { %s1455_s17 = smov (%p30_p0, %s28_s17), 0  ;;  %p75_p5 = scmp.eq.s32.totalorder %s810_s16, 1 }
   0xa   : > { %p1081_p4 = por %p69_p2, %p68_p1  ;;  %s53_s20 = ssub.s32 %s1013_s13, %s1455_s17 }
   0xb   : > { %p811_p6 = scmp.ge.s32.totalorder %s1017_s14, 1  ;;  %p56_p7 = scmp.eq.s32.totalorder %s53_s20, 0 }
   0xc   : > { %p1088_p8 = por %p75_p5, %p74_p3  ;;  %p82_p9 = scmp.lt.s32.totalorder %s1017_s14, 3 }
   0xd   : > { %s1094_s22 = scalar_select %p56_p7, %s1005_s11, %s58_s18  }
   0xe   : > { %p1096_p10 = pnand %p811_p6, %p82_p9  ;;  %p1100_p11 = scmp.eq.s32.totalorder %s809_s15, 0 }
   0xf   : > { %s95_s27 = sshll.u32 %s1442_s0, 4  ;;  %s96_s27 = int_to_ptr.vmem [resolvable:$true] %s95_s27 }
  0x10   : > { %p847_p12 = pneg %p1096_p10  ;;  %s918_s28 = scalar_lea.vmem %s96_s27, 32 }
  0x11   : > { %p919_p0 = scmp.ne.s32.totalorder %s96_s27, %s918_s28  ;;  %p926_p5 = scmp.lt.s32.totalorder %s96_s27, %s96_s27 }
  0x12   : > { %p848_p13 = pnand %p1100_p11, %p847_p12  ;;  %p927_p6 = scmp.lt.s32.totalorder %s918_s28, %s918_s28 }
  0x14   : > { %p920_p1 = pneg %p848_p13  ;;  %p928_p7 = por %p927_p6, %p926_p5 }
  0x16   : > { %p921_p2 = pnand %p920_p1, %p919_p0 }
  0x18   : > { %p922_p3 = pneg %p921_p2 }
  0x1a   : > { %p929_p9 = pnand %p928_p7, %p922_p3 }
  0x1c   : > { %932 = shalt.err (!%p929_p9)
}
  0x1d   : > { %s1019_s29 = smov [#allocation4]   ;;  %108 = sbr.rel (%p1096_p10) target bundleno = 363 (0x16b), region = 24 }
  0x1e   : > { %850 = dma.vmem_to_smem (!%p848_p13), %s96_s27, 32, %s1019_s29, [#allocation6]  }
  0x24   : > { %986 = dma.done.wait (%p1100_p11), [#allocation6], 32  }
  0x25   : > { %988 = vsyncadd (%p1100_p11), [#allocation6], 4294967264 }
  0x26   : > { %114 = sfence }
  0x27   : > { %s121_s30 = sand.u32 1, %s1001_s10   ;;  %s815_s3 = sshll.u32 %s1009_s12, 7 }
  0x28   : > { %s839_s4 = smul.u32 48, %s121_s30  ;;  %s1121_s5 = sld [smem:[#allocation4 + %s815_s3]] }
  0x29   : > { %s139_s6 = sadd.s32 1, %s815_s3  ;;  %s141_s7 = sadd.s32 2, %s815_s3 }
  0x2a   : > { %s1123_s8 = sld [smem:[#allocation4 + %s139_s6]]  ;;  %s143_s16 = sadd.s32 3, %s815_s3 }
  0x2b   : > { %s142_s15 = sld [smem:[#allocation4 + %s141_s7]]  ;;  %s150_s20 = smul.u32 24, %s1009_s12 }
  0x2c   : > { %s144_s18 = sld [smem:[#allocation4 + %s143_s16]]  ;;  %s1129_s26 = scalar_lea.vmem [#allocation7], %s839_s4 }
  0x2d   : > { %s152_s25 = scalar_lea.vmem %s1443_s1, %s150_s20 }
  0x2e   : > { %v193_v0 = vld [vmem:[%s152_s25] sm:$0xff]  ;;  %v195_v1 = vld [vmem:[%s152_s25 + $0x8] sm:$0xff]  ;;  %v816_v2 = vld [vmem:[%s152_s25 + $0x10] sm:$0x3] }
  0x2f   : > { %194 = vst [vmem:[#allocation2] sm:$0xff] %v193_v0  ;;  %196 = vst [vmem:[#allocation2 + $0x8] sm:$0xff] %v195_v1 }
  0x30   : > { %817 = vst [vmem:[#allocation2 + $0x10] sm:$0x3] %v816_v2 }
  0x31   : > { %211 = vsyncadd [#allocation3], 288 }
  0x32   : > { %989 = dma.done.wait [#allocation3], 288 }
  0x33   : > { %990 = vsyncadd [#allocation3], 4294967008  ;;  %v291_v3 = vlaneseq  ;;  %v306_v6 = vstv %s142_s15  ;;  %v315_v11 = vstv %s144_s18  ;;  %v311_v17 = vstv %s1121_s5  ;;  %s1020_s27 = smov 127   ;;  %s1021_s28 = smov 1  }
  0x34   : > { %v322_v23 = vstv %s1123_s8  ;;  %vm359_vm0 = vcmask 1040384   ;;  %vm353_vm1 = vcmask 1047554   ;;  %vm424_vm2 = vcmask 1046528   ;;  %s840_s29 = smul.u32 768, %s1009_s12  ;;  %s676_s3 = sshll.u32 %s1129_s26, 4  ;;  %s1389_s3 = int_to_ptr.vmem [resolvable:$true] %s676_s3 }
  0x35   : > { %v1131_v4 = vand.u32 127, %v291_v3  ;;  %v294_v5 = vshrl.u32 %v291_v3, 7  ;;  %s1396_s6 = scalar_lea.sflag [#allocation5], %s121_s30  ;;  %s933_s7 = scalar_lea.vmem %s1389_s3, 768 }
  0x36   : > { %v1137_v16 = vld [vmem:[#allocation2] sm:$0xff]  ;;  %v1140_v18 = vld [vmem:[#allocation2 + $0x8] sm:$0xff]  ;;  %s1387_s5 = scalar_lea.hbm %s1444_s2, %s840_s29  ;;  %p934_p10 = scmp.ne.s32.totalorder %s1389_s3, %s933_s7 }
  0x37   : > { %v302_v7 = vcvt.s32.f32 %v1131_v4  ;;  %v1134_v8 = vadd.s32 4294967295, %v294_v5  ;;  %v295_v9 = vadd.s32 8, %v294_v5  ;;  %v296_v10 = vadd.s32 16, %v294_v5  ;;  %v1154_v31 = vld [vmem:[#allocation2 + $0x10] sm:$0x3]  ;;  %s1023_s8 = smov [#allocation7]  }
  0x38   : > { %v392_v48 = vrot.slane %v1137_v16, 7  ;;  %v393_v49 = vrot.slane %v1140_v18, 7  ;;  %v387_v52 = vrot.slane %v1137_v16, 6  ;;  %v395_v53 = vrot.slane %v1154_v31, 7  ;;  %p935_p11 = pnand %p934_p10, %p1081_p4  ;;  %s937_s15 = sshll.u32 %s1023_s8, 4  ;;  %s938_s15 = int_to_ptr.vmem [resolvable:$false] %s937_s15 }
  0x39   : > { %v307_v12 = vsub.f32 %v302_v7, %v306_v6  ;;  %v303_v13 = vcvt.s32.f32 %v1134_v8  ;;  %v300_v14 = vadd.s32 4294967295, %v295_v9  ;;  %v301_v15 = vadd.s32 4294967295, %v296_v10  ;;  %s939_s16 = scalar_lea.vmem %s938_s15, 1536  ;;  %p940_p13 = scmp.lt.s32.totalorder %s1389_s3, %s938_s15 }
  0x3a   : > { %v394_v60 = vsel %vm359_vm0, %v392_v48, %v393_v49  ;;  %v388_v0 = vsel %vm353_vm1, %v387_v52, %v1154_v31  ;;  %v396_v3 = vsel %vm359_vm0, %v393_v49, %v395_v53  ;;  %v400_v6 = vsub.f32 %v1137_v16, %v392_v48  ;;  %p936_p12 = pneg %p935_p11  ;;  %p941_p0 = scmp.lt.s32.totalorder %s939_s16, %s933_s7 }
  0x3b   : > { %v308_v19 = vmul.f32 %v307_v12, %v1137_v16  ;;  %v316_v20 = vsub.f32 %v303_v13, %v315_v11  ;;  %v309_v21 = vmul.f32 %v307_v12, %v1140_v18  ;;  %v304_v22 = vcvt.s32.f32 %v300_v14 }
  0x3c   : > { %v305_v27 = vcvt.s32.f32 %v301_v15  ;;  %v310_v34 = vmul.f32 %v307_v12, %v1154_v31  ;;  %v401_v7 = vsub.f32 %v1140_v18, %v394_v60  ;;  %vm617_vm3 = vcmp.ge.s32.totalorder %v1134_v8, 1  ;;  %p942_p1 = por %p941_p0, %p940_p13 }
  0x3d   : > { %v1145_v24 = vmul.f32 %v311_v17, %v308_v19  ;;  %v319_v25 = vmul.f32 %v316_v20, %v1137_v16  ;;  %v317_v26 = vsub.f32 %v304_v22, %v315_v11  ;;  %v1151_v29 = vmul.f32 %v311_v17, %v309_v21 }
  0x3e   : > { %v318_v33 = vsub.f32 %v305_v27, %v315_v11  ;;  %v1164_v36 = vmul.f32 %v311_v17, %v310_v34  ;;  %v402_v11 = vsub.f32 %v388_v0, %v396_v3  ;;  %v459_v19 = vrot.slane %v400_v6, 1  ;;  %p943_p2 = pnand %p942_p1, %p936_p12 }
  0x3f   : > { %326 = vrot.lane.b32.xlu0 %v1145_v24, %s1020_s27  ;;  %v1149_v28 = vmul.f32 %v322_v23, %v319_v25  ;;  %v320_v30 = vmul.f32 %v317_v26, %v1140_v18  ;;  %v361_v40 = vrot.slane %v1151_v29, 7  ;;  %v360_v41 = vrot.slane %v1145_v24, 7 }
  0x40   : > { %v321_v35 = vmul.f32 %v318_v33, %v1154_v31  ;;  %v363_v44 = vrot.slane %v1164_v36, 7  ;;  %v354_v45 = vrot.slane %v1145_v24, 6  ;;  %v460_v20 = vrot.slane %v401_v7, 1 }
  0x41   : > { %335 = vrot.lane.b32.xlu1 %v1149_v28, %s1020_s27  ;;  %v1157_v32 = vmul.f32 %v322_v23, %v320_v30  ;;  %v376_v38 = vrot.slane %v1149_v28, 7  ;;  %v371_v43 = vrot.slane %v1149_v28, 6  ;;  %v362_v47 = vsel %vm359_vm0, %v360_v41, %v361_v40 }
  0x42   : > { %v1167_v37 = vmul.f32 %v322_v23, %v321_v35  ;;  %v368_v51 = vsub.f32 %v1145_v24, %v360_v41  ;;  %v369_v56 = vsub.f32 %v1151_v29, %v362_v47  ;;  %v355_v58 = vsel %vm353_vm1, %v354_v45, %v1164_v36 }
  0x43   : > { %328 = vrot.lane.b32.xlu0 %v1151_v29, %s1020_s27  ;;  %v377_v39 = vrot.slane %v1157_v32, 7  ;;  %v384_v50 = vsub.f32 %v1149_v28, %v376_v38  ;;  %v364_v59 = vsel %vm359_vm0, %v361_v40, %v363_v44  ;;  %v462_v26 = vrot.slane %v402_v11, 1 }
  0x44   : > { %v379_v42 = vrot.slane %v1167_v37, 7  ;;  %v372_v54 = vsel %vm353_vm1, %v371_v43, %v1167_v37  ;;  %v425_v62 = vrot.slane %v368_v51, 1  ;;  %v426_v2 = vrot.slane %v369_v56, 1 }
  0x45   : > { %337 = vrot.lane.b32.xlu1 %v1157_v32, %s1020_s27  ;;  %v378_v46 = vsel %vm359_vm0, %v376_v38, %v377_v39  ;;  %v442_v61 = vrot.slane %v384_v50, 1  ;;  %v370_v5 = vsub.f32 %v355_v58, %v364_v59  ;;  %v461_v35 = vsel %vm424_vm2, %v459_v19, %v460_v20 }
  0x46   : > { %v385_v55 = vsub.f32 %v1157_v32, %v378_v46  ;;  %v380_v57 = vsel %vm359_vm0, %v377_v39, %v379_v42  ;;  %v1207_v14 = vsel %vm424_vm2, %v425_v62, %v426_v2  ;;  %v1237_v41 = vsel %vm424_vm2, %v460_v20, %v462_v26 }
  0x47   : > { %344 = vrot.lane.b32.xlu0 %v1137_v16, %s1020_s27  ;;  %v386_v63 = vsub.f32 %v372_v54, %v380_v57  ;;  %v1211_v17 = vrot.slane %v370_v5, 1  ;;  %v467_v19 = vrot.slane %v461_v35, 6  ;;  %vm626_vm4 = vcmp.ge.s32.totalorder %v1131_v4, 1 }
  0x48   : > { %v443_v1 = vrot.slane %v385_v55, 1  ;;  %vm627_vm5 = vmand %vm617_vm3, %vm626_vm4  ;;  %vm630_vm6 = vcmp.le.s32.totalorder %v1131_v4, 14 }
  0x49   : > { %346 = vrot.lane.b32.xlu1 %v1140_v18, %s1020_s27  ;;  %v1209_v15 = vrot.slane %v386_v63, 1  ;;  %v1228_v34 = vsel %vm424_vm2, %v426_v2, %v1211_v17  ;;  %vm631_vm7 = vmand %vm627_vm5, %vm630_vm6 }
  0x4a   : > { %v1204_v12 = vsel %vm424_vm2, %v442_v61, %v443_v1  ;;  %v435_v11 = vrot.slane %v1228_v34, 6  ;;  %vm632_vm9 = vmand %vm626_vm4, %vm630_vm6 }
  0x4b   : > { %330 = vrot.lane.b32.xlu0 %v1164_v36, %s1020_s27  ;;  %v1224_v30 = vsel %vm424_vm2, %v443_v1, %v1209_v15 }
  0x4c   : > { %v452_v20 = vrot.slane %v1224_v30, 6 }
  0x4d   : > { %339 = vrot.lane.b32.xlu1 %v1167_v37, %s1020_s27 }
  0x4f   : > { %348 = vrot.lane.b32.xlu0 %v1154_v31, %s1020_s27 }
  0xb1   : > { %v327_v9 = vpop.permute.xlu0 %326 }
  0xb2   : > { %v332_v10 = vsub.f32 %v1145_v24, %v327_v9 }
  0xb3   : > { %v336_v13 = vpop.permute.xlu1 %335 }
  0xb4   : > { %v341_v21 = vsub.f32 %v1149_v28, %v336_v13  ;;  %403 = vrot.lane.b32.xlu1 %v332_v10, %s1021_s28  ;;  %v1216_v23 = vmul.f32 %v1204_v12, %v332_v10  ;;  %v1246_v45 = vmul.f32 %v461_v35, %v332_v10  ;;  %v450_v13 = vrot.slane %v1204_v12, 6 }
  0xb5   : > { %v329_v22 = vpop.permute.xlu0 %328 }
  0xb6   : > { %v1219_v25 = vmul.f32 %v1207_v14, %v341_v21  ;;  %v333_v27 = vsub.f32 %v1151_v29, %v329_v22  ;;  %v1248_v46 = vmul.f32 %v461_v35, %v341_v21 }
  0xb7   : > { %v338_v33 = vpop.permute.xlu1 %337 }
  0xb8   : > { %v554_v38 = vsub.f32 %v1216_v23, %v1219_v25  ;;  %v342_v39 = vsub.f32 %v1157_v32, %v338_v33  ;;  %409 = vrot.lane.b32.xlu1 %v341_v21, %s1021_s28  ;;  %405 = vrot.lane.b32.xlu0 %v333_v27, %s1021_s28  ;;  %v1240_v42 = vmul.f32 %v1224_v30, %v333_v27  ;;  %v469_v21 = vrot.slane %v1237_v41, 6 }
  0xb9   : > { %v345_v40 = vpop.permute.xlu0 %344  ;;  %v1261_v52 = vmul.f32 %v1237_v41, %v333_v27  ;;  %v451_v33 = vsel %vm353_vm1, %v450_v13, %v1209_v15 }
  0xba   : > { %v1243_v43 = vmul.f32 %v1228_v34, %v342_v39  ;;  %v350_v44 = vsub.f32 %v1137_v16, %v345_v40  ;;  %v1264_v53 = vmul.f32 %v1237_v41, %v342_v39  ;;  %v499_v41 = vrot.slane %v451_v33, 1 }
  0xbb   : > { %v347_v47 = vpop.permute.xlu1 %346 }
  0xbc   : > { %v555_v48 = vsub.f32 %v1240_v42, %v1243_v43  ;;  %v1253_v49 = vmul.f32 %v1204_v12, %v350_v44  ;;  %v1256_v50 = vmul.f32 %v1207_v14, %v350_v44  ;;  %v351_v51 = vsub.f32 %v1140_v18, %v347_v47  ;;  %415 = vrot.lane.b32.xlu1 %v350_v44, %s1021_s28 }
  0xbd   : > { %411 = vrot.lane.b32.xlu0 %v342_v39, %s1021_s28  ;;  %v331_v54 = vpop.permute.xlu0 %330  ;;  %v454_v39 = vsel %vm353_vm1, %v452_v20, %v450_v13  ;;  %v471_v12 = vsel %vm353_vm1, %v469_v21, %v467_v19 }
  0xbe   : > { %v479_v55 = vsub.f32 %v1248_v46, %v1253_v49  ;;  %v522_v56 = vsub.f32 %v1256_v50, %v1246_v45  ;;  %v1272_v57 = vmul.f32 %v1224_v30, %v351_v51  ;;  %v1275_v58 = vmul.f32 %v1228_v34, %v351_v51 }
  0xbf   : > { %v334_v59 = vsub.f32 %v1164_v36, %v331_v54  ;;  %v340_v60 = vpop.permute.xlu1 %339  ;;  %v453_v30 = vrot.slane %v451_v33, 6  ;;  %v500_v47 = vrot.slane %v454_v39, 1  ;;  %v486_v54 = vrot.slane %v471_v12, 1 }
  0xc0   : > { %v480_v61 = vsub.f32 %v1264_v53, %v1272_v57  ;;  %v523_v62 = vsub.f32 %v1275_v58, %v1261_v52  ;;  %v343_v63 = vsub.f32 %v1167_v37, %v340_v60 }
  0xc1   : > { %v1284_v0 = vmul.f32 %v1209_v15, %v334_v59  ;;  %417 = vrot.lane.b32.xlu0 %v351_v51, %s1021_s28  ;;  %407 = vrot.lane.b32.xlu1 %v334_v59, %s1021_s28  ;;  %v349_v1 = vpop.permute.xlu0 %348  ;;  %v1288_v2 = vmul.f32 %v462_v26, %v334_v59  ;;  %v455_v60 = vsel %vm353_vm1, %v453_v30, %v452_v20 }
  0xc2   : > { %v1290_v36 = vmul.f32 %v462_v26, %v343_v63  ;;  %v1293_v3 = vmul.f32 %v1211_v17, %v343_v63  ;;  %v352_v5 = vsub.f32 %v1154_v31, %v349_v1  ;;  %v433_v31 = vrot.slane %v1207_v14, 6 }
  0xc3   : > { %v468_v14 = vsel %vm353_vm1, %v467_v19, %v462_v26  ;;  %v501_v26 = vsel %vm424_vm2, %v499_v41, %v500_v47 }
  0xc4   : > { %v1297_v6 = vmul.f32 %v1209_v15, %v352_v5  ;;  %v1300_v37 = vmul.f32 %v1211_v17, %v352_v5  ;;  %v556_v7 = vsub.f32 %v1284_v0, %v1293_v3  ;;  %v434_v22 = vsel %vm353_vm1, %v433_v31, %v1211_v17 }
  0xc5   : > { %413 = vrot.lane.b32.xlu0 %v343_v63, %s1021_s28  ;;  %419 = vrot.lane.b32.xlu1 %v352_v5, %s1021_s28  ;;  %v437_v27 = vsel %vm353_vm1, %v435_v11, %v433_v31  ;;  %v436_v34 = vrot.slane %v434_v22, 6  ;;  %v528_v35 = vrot.slane %v434_v22, 1  ;;  %v470_v44 = vrot.slane %v468_v14, 6 }
  0xc6   : > { %v524_v9 = vsub.f32 %v1300_v37, %v1288_v2  ;;  %v481_v10 = vsub.f32 %v1290_v36, %v1297_v6  ;;  %v529_v40 = vrot.slane %v437_v27, 1  ;;  %v485_v17 = vrot.slane %v468_v14, 1 }
  0xc7   : > { %v438_v59 = vsel %vm353_vm1, %v436_v34, %v435_v11  ;;  %v472_v1 = vsel %vm353_vm1, %v470_v44, %v469_v21  ;;  %v502_v22 = vrot.slane %v455_v60, 1 }
  0xc8   : > { %v530_v15 = vsel %vm424_vm2, %v528_v35, %v529_v40  ;;  %v531_v5 = vrot.slane %v438_v59, 1  ;;  %v487_v31 = vsel %vm424_vm2, %v485_v17, %v486_v54  ;;  %v488_v33 = vrot.slane %v472_v1, 1 }
  0xc9   : > { %v503_v41 = vsel %vm424_vm2, %v500_v47, %v502_v22 }
  0xca   : > { %v532_v11 = vsel %vm424_vm2, %v529_v40, %v531_v5  ;;  %v489_v21 = vsel %vm424_vm2, %v486_v54, %v488_v33 }
 0x126   : > { %v404_v51 = vpop.permute.xlu1 %403 }
 0x127   : > { %v557_v27 = vmul.f32 %v501_v26, %v404_v51  ;;  %v539_v39 = vmul.f32 %v487_v31, %v404_v51 }
 0x12a   : > { %v410_v63 = vpop.permute.xlu1 %409  ;;  %v406_v19 = vpop.permute.xlu0 %405 }
 0x12b   : > { %v560_v13 = vmul.f32 %v530_v15, %v410_v63  ;;  %v493_v34 = vmul.f32 %v487_v31, %v410_v63  ;;  %v558_v51 = vmul.f32 %v503_v41, %v406_v19  ;;  %v540_v63 = vmul.f32 %v489_v21, %v406_v19 }
 0x12d   : > { %v563_v12 = vsub.f32 %v557_v27, %v560_v13 }
 0x12e   : > { %v416_v14 = vpop.permute.xlu1 %415 }
 0x12f   : > { %v507_v20 = vmul.f32 %v501_v26, %v416_v14  ;;  %v536_v35 = vmul.f32 %v530_v15, %v416_v14  ;;  %v412_v30 = vpop.permute.xlu0 %411  ;;  %v566_v60 = vadd.f32 %v563_v12, %v554_v38 }
 0x130   : > { %v561_v59 = vmul.f32 %v532_v11, %v412_v30  ;;  %v494_v54 = vmul.f32 %v489_v21, %v412_v30 }
 0x131   : > { %v510_v44 = vsub.f32 %v493_v34, %v507_v20  ;;  %v542_v17 = vsub.f32 %v536_v35, %v539_v39  ;;  %v578_v38 = vmul.f32 %v566_v60, %v566_v60 }
 0x132   : > { %v564_v27 = vsub.f32 %v558_v51, %v561_v59 }
 0x133   : > { %v513_v40 = vadd.f32 %v510_v44, %v479_v55  ;;  %v545_v15 = vadd.f32 %v542_v17, %v522_v56  ;;  %v408_v26 = vpop.permute.xlu1 %407  ;;  %v418_v47 = vpop.permute.xlu0 %417 }
 0x134   : > { %v508_v1 = vmul.f32 %v503_v41, %v418_v47  ;;  %v537_v39 = vmul.f32 %v532_v11, %v418_v47  ;;  %v541_v23 = vmul.f32 %v488_v33, %v408_v26  ;;  %v559_v34 = vmul.f32 %v502_v22, %v408_v26 }
 0x135   : > { %v569_v31 = vmul.f32 %v513_v40, %v513_v40  ;;  %v572_v13 = vmul.f32 %v545_v15, %v545_v15  ;;  %v567_v11 = vadd.f32 %v564_v27, %v555_v48  ;;  %v1022_v47 = vmov 1.0  }
 0x136   : > { %v511_v25 = vsub.f32 %v494_v54, %v508_v1  ;;  %v543_v46 = vsub.f32 %v537_v39, %v540_v63 }
 0x137   : > { %v575_v14 = vadd.f32 %v572_v13, %v569_v31  ;;  %v420_v49 = vpop.permute.xlu1 %419  ;;  %v414_v55 = vpop.permute.xlu0 %413  ;;  %v579_v43 = vmul.f32 %v567_v11, %v567_v11 }
 0x138   : > { %v514_v45 = vadd.f32 %v511_v25, %v480_v61  ;;  %v509_v50 = vmul.f32 %v502_v22, %v420_v49  ;;  %v538_v56 = vmul.f32 %v531_v5, %v420_v49  ;;  %v495_v19 = vmul.f32 %v488_v33, %v414_v55 }
 0x139   : > { %v581_v12 = vadd.f32 %v578_v38, %v575_v14  ;;  %v546_v20 = vadd.f32 %v543_v46, %v523_v62  ;;  %v562_v35 = vmul.f32 %v531_v5, %v414_v55 }
 0x13a   : > { %v570_v30 = vmul.f32 %v514_v45, %v514_v45  ;;  %v544_v41 = vsub.f32 %v538_v56, %v541_v23  ;;  %v512_v21 = vsub.f32 %v495_v19, %v509_v50 }
 0x13b   : > { %v584_v44 = vmax.f32 %v581_v12, 1e-24  ;;  %v573_v17 = vmul.f32 %v546_v20, %v546_v20  ;;  %v565_v53 = vsub.f32 %v559_v34, %v562_v35 }
 0x13c   : > { %v547_v57 = vadd.f32 %v544_v41, %v524_v9  ;;  %v515_v42 = vadd.f32 %v512_v21, %v481_v10 }
 0x13d   : > { %912 = vrsqrt.f32 %v584_v44  ;;  %v576_v48 = vadd.f32 %v573_v17, %v570_v30  ;;  %v568_v52 = vadd.f32 %v565_v53, %v556_v7 }
 0x13e   : > { %v574_v58 = vmul.f32 %v547_v57, %v547_v57  ;;  %v571_v61 = vmul.f32 %v515_v42, %v515_v42 }
 0x13f   : > { %v582_v62 = vadd.f32 %v579_v43, %v576_v48  ;;  %v580_v22 = vmul.f32 %v568_v52, %v568_v52 }
 0x140   : > { %v577_v5 = vadd.f32 %v574_v58, %v571_v61 }
 0x141   : > { %v585_v33 = vmax.f32 %v582_v62, 1e-24 }
 0x142   : > { %v583_v59 = vadd.f32 %v580_v22, %v577_v5 }
 0x143   : > { %914 = vrsqrt.f32 %v585_v33 }
 0x144   : > { %v586_v2 = vmax.f32 %v583_v59, 1e-24 }
 0x146   : > { %916 = vrsqrt.f32 %v586_v2 }
 0x147   : > { %v913_v37 = vpop.eup %912 }
 0x148   : > { %v590_v36 = vmul.f32 %v913_v37, %v513_v40  ;;  %v593_v6 = vmul.f32 %v913_v37, %v545_v15  ;;  %v596_v9 = vmul.f32 %v913_v37, %v566_v60 }
 0x14a   : > { %v599_v0 = vmul.f32 %v590_v36, %v1145_v24  ;;  %v602_v3 = vmul.f32 %v593_v6, %v1149_v28  ;;  %v608_v10 = vmul.f32 %v596_v9, %v1137_v16 }
 0x14c   : > { %v605_v7 = vadd.f32 %v602_v3, %v599_v0 }
 0x14d   : > { %v915_v51 = vpop.eup %914 }
 0x14e   : > { %v611_v40 = vadd.f32 %v608_v10, %v605_v7  ;;  %v591_v15 = vmul.f32 %v915_v51, %v514_v45  ;;  %v594_v60 = vmul.f32 %v915_v51, %v546_v20  ;;  %v597_v26 = vmul.f32 %v915_v51, %v567_v11 }
 0x150   : > { %v917_v8 = vpop.eup %916  ;;  %vm614_vm8 = vcmp.gt.f32.partialorder %v611_v40, 0.0  ;;  %v600_v24 = vmul.f32 %v591_v15, %v1151_v29  ;;  %v603_v28 = vmul.f32 %v594_v60, %v1157_v32  ;;  %v609_v27 = vmul.f32 %v597_v26, %v1140_v18 }
 0x151   : > { %v634_v63 = vsel %vm614_vm8, -1.0, %v1022_v47  ;;  %v592_v16 = vmul.f32 %v917_v8, %v515_v42  ;;  %v595_v54 = vmul.f32 %v917_v8, %v547_v57  ;;  %v598_v1 = vmul.f32 %v917_v8, %v568_v52 }
 0x152   : > { %v637_v31 = vsel %vm631_vm7, %v634_v63, 0.0  ;;  %v606_v13 = vadd.f32 %v603_v28, %v600_v24 }
 0x153   : > { %v640_v39 = vmul.f32 %v637_v31, %v590_v36  ;;  %v643_v29 = vmul.f32 %v637_v31, %v593_v6  ;;  %v646_v32 = vmul.f32 %v637_v31, %v596_v9  ;;  %v642_v23 = vmul.f32 0.0, %v592_v16 }
 0x154   : > { %v612_v25 = vadd.f32 %v609_v27, %v606_v13  ;;  %v645_v38 = vmul.f32 0.0, %v595_v54  ;;  %v648_v14 = vmul.f32 0.0, %v598_v1 }
 0x155   : > { %649 = vst [vmem:[%s1129_s26 - $0x1] sm:$0xfe] %v640_v39  ;;  %828 = vst [vmem:[%s1129_s26 + $0xf] sm:$0xfe] %v643_v29 }
 0x156   : > { %831 = vst [vmem:[%s1129_s26 + $0x1f] sm:$0xfe] %v646_v32  ;;  %651 = vst [vmem:[%s1129_s26 + $0xf] sm:$0x1] %v642_v23  ;;  %vm615_vm10 = vcmp.gt.f32.partialorder %v612_v25, 0.0 }
 0x157   : > { %830 = vst [vmem:[%s1129_s26 + $0x1f] sm:$0x1] %v645_v38  ;;  %833 = vst [vmem:[%s1129_s26 + $0x2f] sm:$0x1] %v648_v14  ;;  %v635_v18 = vsel %vm615_vm10, -1.0, %v1022_v47 }
 0x158   : > { %v638_v34 = vsel %vm632_vm9, %v635_v18, 0.0 }
 0x159   : > { %v641_v4 = vmul.f32 %v638_v34, %v591_v15  ;;  %v644_v46 = vmul.f32 %v638_v34, %v594_v60  ;;  %v647_v49 = vmul.f32 %v638_v34, %v597_v26 }
 0x15b   : > { %650 = vst [vmem:[%s1129_s26 + $0x7] sm:$0xff] %v641_v4  ;;  %829 = vst [vmem:[%s1129_s26 + $0x17] sm:$0xff] %v644_v46 }
 0x15c   : > { %832 = vst [vmem:[%s1129_s26 + $0x27] sm:$0xff] %v647_v49 }
 0x15d   : > { %946 = shalt.err (!%p943_p2)
}
 0x15e   : > { %s947_s30 = scalar_lea.hbm %s1387_s5, 768  ;;  %s951_s23 = scalar_lea.hbm %s1444_s2, 1536 }
 0x15f   : > { %p948_p3 = scmp.ne.s32.totalorder %s1387_s5, %s947_s30  ;;  %p952_p7 = scmp.lt.u32.totalorder %s1387_s5, %s1444_s2 }
 0x160   : > { %p953_p9 = scmp.lt.u32.totalorder %s951_s23, %s947_s30  ;;  %p955_p11 = scmp.lt.u32.totalorder %s947_s30, %s1387_s5 }
 0x161   : > { %p949_p5 = pnand %p948_p3, %p1081_p4 }
 0x162   : > { %p954_p10 = por %p953_p9, %p952_p7 }
 0x163   : > { %p950_p6 = pneg %p949_p5 }
 0x164   : > { %p956_p12 = por %p955_p11, %p954_p10 }
 0x166   : > { %p957_p13 = pnand %p956_p12, %p950_p6 }
 0x168   : > { %960 = shalt.err (!%p957_p13)
}
 0x169   : > { %s1024_s26 = smov 128   ;;  %s1025_s27 = smov 8  }
 0x16a   : > { %845 = dma.vmem_to_hbm [thread:$0]  (%p1081_p4), %s1389_s3, 768, %s1387_s5, %s1396_s6, %s1024_s26, %s1024_s26, %s1025_s27  }
 0x16b PF: > { %p857_p0 = scmp.ge.s32.totalorder %s1017_s14, 2  ;;  %s691_s28 = sand.u32 1, %s997_s9  }
 0x16c   : > { %s692_s29 = scalar_lea.sflag [#allocation5], %s691_s28 }
 0x16d   : > { %p852_p1 = pnand %p857_p0, %p1088_p8 }
 0x16f   : > { %992 = dma.done.wait (!%p852_p1), %s692_s29, 768  }
 0x170   : > { %994 = vsyncadd (!%p852_p1), %s692_s29, 4294966528  ;;  %s16_s14 = sadd.s32 1, %s1017_s14   ;;  %s1449_s9 = smov %s1001_s10 }
 0x171   : > { %p13_p2 = scmp.ge.s32.totalorder %s16_s14, 4   ;;  %s1450_s10 = smov %s1005_s11 }
 0x172   : > { %s1451_s11 = smov %s1094_s22  ;;  %s1452_s12 = smov %s1013_s13 }
 0x173   : > { %s1453_s13 = smov %s1455_s17  ;;  %15 = sbr.rel (!%p13_p2) target bundleno = 5 (0x5), region = 182 }
 0x17a   :  { %697 = vsyncpa [#allocation5], 1 }
 0x17b   :  { %699 = vsyncpa [#allocation5 + $0x1], 1 }
 0x17c   :  { %700 = vsyncpa [#allocation6], 1 }
 0x17d   :  { %702 = vsyncpa [#allocation6 + $0x1], 1 }
 0x17e   :  { %703 = vsyncmov [#allocation3] }
 0x181   :  { %s704_s19 = vpop.sfrf %703 }
 0x182   :  { %p837_p4 = scmp.ne.s32.totalorder %s704_s19, 0 }
 0x184   :  { %708 = shalt.err (%p837_p4)  }
 0x185   :  { %710 = vsyncmov [#allocation3 + $0x1] }
 0x188   :  { %s711_s21 = vpop.sfrf %710 }
 0x189   :  { %p838_p8 = scmp.ne.s32.totalorder %s711_s21, 0 }
 0x18b   :  { %715 = shalt.err (%p838_p8)  }

</bundles_post_ra>
